<compile_context>
chip_gen: v6e
topology: v6e:2x2x1
jax: 0.10.0
libtpu: 0.0.40
codegen_flags: <defaults>
</compile_context>

<pallas_src>
import functools

import numpy as np
import jax
import jax.numpy as jnp
from jax.experimental import pallas as pl
from jax.experimental.pallas import tpu as pltpu


# ----------------------------------------------------------------------------
# Pallas kernel
# ----------------------------------------------------------------------------
def _hoaf_kernel(x_ref, s_ref, w_ref, b_ref, o_ref, *, p2_rows, include_identity):
    # x_ref / o_ref blocks are (C, TN): batch dim squeezed by the BlockSpec.
    x = x_ref[...].astype(jnp.float32)                                  # (C, TN)
    # Fused pair-operand selection: a single MXU matmul yields both factors.
    sel = jnp.dot(s_ref[...], x, preferred_element_type=jnp.float32)    # (2*P2p, TN)
    pairs = sel[:p2_rows, :] * sel[p2_rows:, :]                         # (P2p, TN)
    # Grouped 1x1 conv as a block-diagonal dense matmul; beta2 pre-folded into W / b.
    y = jnp.dot(w_ref[...], pairs, preferred_element_type=jnp.float32) + b_ref[...]
    if include_identity:
        y = y + x
    o_ref[...] = y.astype(o_ref.dtype)


# ----------------------------------------------------------------------------
# Host-side operand preparation: fold beta2, build fused selection / conv matrices.
# ----------------------------------------------------------------------------
def make_hoaf_operands(w2, b2, beta2, num_groups, num_channels):
    """w2: (C, C2) conv2 weight, b2: (C,) bias, beta2: (C,) scale.

    Returns:
      S  (2*P2p, C): rows [0, P2) select the first factor of each pair,
                     rows [P2p, P2p+P2) the second factor; padded rows are zero.
      Wf (C, P2p):   block-diagonal conv weight pre-scaled by beta2 (zero pad cols).
      bf (C, 1):     beta2 * bias.
    P2p = P2 rounded up to a multiple of 8 so the in-kernel slice of the f32 `sel`
    intermediate is sublane-aligned (sel/pairs are always f32, so 8 is sufficient).
    """
    C = num_channels
    G = num_groups
    chg = C // G
    C2 = chg * (chg + 1) // 2
    P2 = G * C2
    P2p = ((P2 + 7) // 8) * 8

    w2 = np.asarray(w2, np.float32).reshape(C, C2)
    b2 = np.asarray(b2, np.float32).reshape(C)
    beta2 = np.asarray(beta2, np.float32).reshape(C)

    S = np.zeros((2 * P2p, C), np.float32)
    Wf = np.zeros((C, P2p), np.float32)
    for g in range(G):
        k = 0
        for i in range(chg):
            for j in range(i, chg):
                p = g * C2 + k
                S[p, g * chg + i] = 1.0
                S[P2p + p, g * chg + j] = 1.0
                for oc in range(chg):
                    c = g * chg + oc
                    Wf[c, p] = beta2[c] * w2[c, k]
                k += 1
    bf = (beta2 * b2).reshape(C, 1)
    return jnp.asarray(S), jnp.asarray(Wf), jnp.asarray(bf)


# ----------------------------------------------------------------------------
# VMEM-aware tile selection
# ----------------------------------------------------------------------------
def _vmem_cap_bytes():
    """~75% of physical VMEM per core (48 MiB on v7x, 96 MiB on v5e/v6e)."""
    try:
        cap = int(pltpu.get_tpu_info().vmem_capacity_bytes)
    except Exception:
        cap = 64 << 20   # conservative fallback = v7x physical size
    return (cap * 3) // 4


def _pick_tile_hw(HW, C, P2p, in_itemsize, out_itemsize, vmem_cap):
    # Steady-state VMEM bytes per pixel column:
    #   double-buffered in/out tiles + f32 sel/pairs/y intermediates.
    per_pix = 2 * C * in_itemsize + 2 * C * out_itemsize + (3 * P2p + C) * 4
    weight_bytes = 2 * (2 * P2p * C + C * P2p + C) * 4      # S, Wf, bf (double-buffered)
    budget = max(vmem_cap - weight_bytes - (4 << 20), 1 << 20)
    max_fit = max(budget // per_pix, 128)
    if HW <= min(max_fit, 2048):
        return int(HW)                                       # one full lane-dense block
    return int(max(128, min(2048, (max_fit // 128) * 128)))  # multiple of 128 (lane-dense)


# ----------------------------------------------------------------------------
# Forward wrapper
# ----------------------------------------------------------------------------
def hoaf_v3_forward(x_nchw, S, Wf, bf, num_pow=(1, 2)):
    """x_nchw: (N, C, H, W). Returns (N, C, H, W) in the same dtype."""
    N, C, H, W = x_nchw.shape
    if 2 not in num_pow:
        # No pair term: output is the identity (or zeros) -> skip the kernel entirely.
        return x_nchw if 1 in num_pow else jnp.zeros_like(x_nchw)

    HW = H * W
    # Free reshape: for each n the (C, H*W) slab is already contiguous/channel-major.
    x3d = x_nchw.reshape(N, C, HW)

    p2_rows = S.shape[0] // 2
    itemsize = jnp.dtype(x_nchw.dtype).itemsize
    vmem_cap = _vmem_cap_bytes()
    tile_hw = _pick_tile_hw(HW, C, p2_rows, itemsize, itemsize, vmem_cap)
    grid = (N, pl.cdiv(HW, tile_hw))

    kernel = functools.partial(_hoaf_kernel, p2_rows=p2_rows,
                               include_identity=(1 in num_pow))

    # Requested scoped VMEM: actual working set with 2x headroom, never the full cap.
    per_pix = 2 * C * itemsize + 2 * C * itemsize + (3 * p2_rows + C) * 4
    weight_bytes = 2 * (S.size + Wf.size + bf.size) * 4
    vmem_est = per_pix * tile_hw + weight_bytes
    vmem_limit = int(min(max(2 * vmem_est, 16 << 20), vmem_cap))

    out3d = pl.pallas_call(
        kernel,
        out_shape=jax.ShapeDtypeStruct((N, C, HW), x_nchw.dtype),
        grid=grid,
        in_specs=[
            # Streamed per-batch pixel tile; batch dim squeezed out of the kernel ref.
            pl.BlockSpec((None, C, tile_hw), lambda n, i: (n, 0, i)),
            # Grid-invariant operands (constant index_map): Pallas fetches them once and
            # keeps them resident.  pipeline_mode=pl.Buffered(1) could drop their second
            # buffer for very large C; negligible here so left at the default.
            pl.BlockSpec(S.shape, lambda n, i: (0, 0)),
            pl.BlockSpec(Wf.shape, lambda n, i: (0, 0)),
            pl.BlockSpec(bf.shape, lambda n, i: (0, 0)),
        ],
        out_specs=pl.BlockSpec((None, C, tile_hw), lambda n, i: (n, 0, i)),
        compiler_params=pltpu.CompilerParams(
            dimension_semantics=("parallel", "parallel"),
            vmem_limit_bytes=vmem_limit),
    )(x3d, S, Wf, bf)

    return out3d.reshape(N, C, H, W)


# ----------------------------------------------------------------------------
# Pure-JAX reference following the PyTorch forward literally (shuffle/chunk/cat).
# ----------------------------------------------------------------------------
def channel_shuffle_jax(x, groups):
    b, c, h, w = x.shape
    cpg = c // groups
    x = x.reshape(b, groups, cpg, h, w)
    x = jnp.transpose(x, (0, 2, 1, 3, 4))
    return x.reshape(b, c, h, w)


def reference_forward(x, params, num_groups, num_pow=(1, 2)):
    N, C, H, W = x.shape
    G = num_groups
    chg = C // G
    C2 = chg * (chg + 1) // 2
    out = jnp.zeros_like(x)
    if 1 in num_pow:
        out = out + x
    if 2 in num_pow:
        xs = channel_shuffle_jax(x, G)
        inp_c = [xs[:, i * G:(i + 1) * G] for i in range(chg)]   # torch.chunk(..., chg, dim=1)
        prods = []
        for i in range(chg):
            for j in range(i, chg):
                prods.append(inp_c[i] * inp_c[j])
        cat = jnp.concatenate(prods, axis=1)                     # (N, C2*G, H, W)
        shuf = channel_shuffle_jax(cat, C2)                      # groups = out_channels2
        # grouped 1x1 conv, groups=G, weight (C, C2), bias (C,)
        w2, b2 = params['w2'], params['b2']
        ys = []
        for g in range(G):
            xg = shuf[:, g * C2:(g + 1) * C2]                    # (N, C2, H, W)
            wg = w2[g * chg:(g + 1) * chg]                       # (chg, C2)
            ys.append(jnp.einsum('nkhw,ok->nohw', xg, wg))
        y = jnp.concatenate(ys, axis=1) + b2.reshape(1, C, 1, 1)
        out = out + y * params['beta2'].reshape(1, C, 1, 1)
    return out


if __name__ == "__main__":
    key = jax.random.PRNGKey(0)
    kx, kw, kb, kbeta = jax.random.split(key, 4)

    N, C, H, W = 2, 4, 16, 16
    num_groups = 2
    num_pow = (1, 2)
    chg = C // num_groups
    C2 = chg * (chg + 1) // 2

    x = jax.random.normal(kx, (N, C, H, W), jnp.float32)
    # conv2 parameters (PyTorch: weight (C, C2, 1, 1), bias (C,)).  beta2 is initialized
    # to ones in the module; use a perturbed value so the host-side beta fold is exercised.
    w2 = jax.random.normal(kw, (C, C2), jnp.float32) * 0.1
    b2 = jax.random.normal(kb, (C,), jnp.float32) * 0.1
    beta2 = 1.0 + 0.1 * jax.random.normal(kbeta, (C,), jnp.float32)

    S, Wf, bf = make_hoaf_operands(w2, b2, beta2, num_groups, C)

    out = jax.block_until_ready(hoaf_v3_forward(x, S, Wf, bf, num_pow=num_pow))

    params = dict(w2=w2, b2=b2, beta2=beta2)
    ref = jax.block_until_ready(reference_forward(x, params, num_groups, num_pow))

    assert out.shape == (N, C, H, W)
    # Tolerance accounts for default (single-pass bf16) MXU precision vs the f32 reference.
    np.testing.assert_allclose(np.asarray(out), np.asarray(ref), rtol=2e-2, atol=2e-2)

    print("KERNEL_OK")
</pallas_src>

<mosaic_0001>
module attributes {stable_mosaic.version = 11 : i64} {
  func.func @_hoaf_kernel(%arg0: i32, %arg1: i32, %arg2: memref<1x4x256xf32, #tpu.memory_space<vmem>>, %arg3: memref<16x4xf32, #tpu.memory_space<vmem>>, %arg4: memref<4x8xf32, #tpu.memory_space<vmem>>, %arg5: memref<4x1xf32, #tpu.memory_space<vmem>>, %arg6: memref<1x4x256xf32, #tpu.memory_space<vmem>>) attributes {dimension_semantics = [#tpu.dimension_semantics<parallel>, #tpu.dimension_semantics<parallel>], iteration_bounds = array<i64: 2, 1>, scalar_prefetch = 0 : i64, scratch_operands = 0 : i64, tpu.core_type = #tpu.core_type<tc>, window_params = [{transform_indices = @transform_0, window_bounds = array<i64: 1, 4, 256>}, {pipeline_mode = #tpu.pipeline_mode<synchronous>, transform_indices = @transform_1, window_bounds = array<i64: 16, 4>}, {pipeline_mode = #tpu.pipeline_mode<synchronous>, transform_indices = @transform_2, window_bounds = array<i64: 4, 8>}, {pipeline_mode = #tpu.pipeline_mode<synchronous>, transform_indices = @transform_3, window_bounds = array<i64: 4, 1>}, {transform_indices = @transform_4, window_bounds = array<i64: 1, 4, 256>}]} {
    %c0 = arith.constant 0 : index
    %c0_0 = arith.constant 0 : index
    %c0_1 = arith.constant 0 : index
    %0 = vector.load %arg2[%c0, %c0_0, %c0_1] : memref<1x4x256xf32, #tpu.memory_space<vmem>>, vector<1x4x256xf32>
    %1 = vector.shape_cast %0 : vector<1x4x256xf32> to vector<4x256xf32>
    %c0_2 = arith.constant 0 : index
    %c0_3 = arith.constant 0 : index
    %2 = vector.load %arg3[%c0_2, %c0_3] : memref<16x4xf32, #tpu.memory_space<vmem>>, vector<16x4xf32>
    %cst = arith.constant dense<0.000000e+00> : vector<16x256xf32>
    %3 = tpu.matmul %2, %1, %cst {dimension_numbers = #tpu.dot_dimension_numbers<[1], [0], [0], [1], [0, 0, 1, 1], [], []>} : vector<16x4xf32>, vector<4x256xf32>, vector<16x256xf32> -> vector<16x256xf32>
    %4 = vector.extract_strided_slice %3 {offsets = [0, 0], sizes = [8, 256], strides = [1, 1]} : vector<16x256xf32> to vector<8x256xf32>
    %5 = vector.extract_strided_slice %3 {offsets = [8, 0], sizes = [8, 256], strides = [1, 1]} : vector<16x256xf32> to vector<8x256xf32>
    %6 = arith.mulf %4, %5 : vector<8x256xf32>
    %c0_4 = arith.constant 0 : index
    %c0_5 = arith.constant 0 : index
    %7 = vector.load %arg4[%c0_4, %c0_5] : memref<4x8xf32, #tpu.memory_space<vmem>>, vector<4x8xf32>
    %cst_6 = arith.constant dense<0.000000e+00> : vector<4x256xf32>
    %8 = tpu.matmul %7, %6, %cst_6 {dimension_numbers = #tpu.dot_dimension_numbers<[1], [0], [0], [1], [0, 0, 1, 1], [], []>} : vector<4x8xf32>, vector<8x256xf32>, vector<4x256xf32> -> vector<4x256xf32>
    %c0_7 = arith.constant 0 : index
    %c0_8 = arith.constant 0 : index
    %9 = vector.load %arg5[%c0_7, %c0_8] : memref<4x1xf32, #tpu.memory_space<vmem>>, vector<4x1xf32>
    %10 = vector.broadcast %9 : vector<4x1xf32> to vector<4x256xf32>
    %11 = arith.addf %8, %10 : vector<4x256xf32>
    %12 = arith.addf %11, %1 : vector<4x256xf32>
    %c0_9 = arith.constant 0 : index
    %c0_10 = arith.constant 0 : index
    %c0_11 = arith.constant 0 : index
    %13 = vector.load %arg6[%c0_9, %c0_10, %c0_11] : memref<1x4x256xf32, #tpu.memory_space<vmem>>, vector<1x4x256xf32>
    %14 = vector.shape_cast %13 : vector<1x4x256xf32> to vector<4x256xf32>
    %15 = vector.shape_cast %12 : vector<4x256xf32> to vector<1x4x256xf32>
    tpu.vector_store %arg6[%c0_9, %c0_10, %c0_11], %15 {strides = array<i32>} : memref<1x4x256xf32, #tpu.memory_space<vmem>>, vector<1x4x256xf32>,
    return
  }
  func.func @transform_0(%arg0: i32, %arg1: i32) -> (i32, i32, i32) {
    %c0_i32 = arith.constant 0 : i32
    %c0_i32_0 = arith.constant 0 : i32
    return %arg0, %c0_i32, %arg1 : i32, i32, i32
  }
  func.func @transform_1(%arg0: i32, %arg1: i32) -> (i32, i32) {
    %c0_i32 = arith.constant 0 : i32
    %c0_i32_0 = arith.constant 0 : i32
    %c0_i32_1 = arith.constant 0 : i32
    return %c0_i32, %c0_i32_0 : i32, i32
  }
  func.func @transform_2(%arg0: i32, %arg1: i32) -> (i32, i32) {
    %c0_i32 = arith.constant 0 : i32
    %c0_i32_0 = arith.constant 0 : i32
    %c0_i32_1 = arith.constant 0 : i32
    return %c0_i32, %c0_i32_0 : i32, i32
  }
  func.func @transform_3(%arg0: i32, %arg1: i32) -> (i32, i32) {
    %c0_i32 = arith.constant 0 : i32
    %c0_i32_0 = arith.constant 0 : i32
    %c0_i32_1 = arith.constant 0 : i32
    return %c0_i32, %c0_i32_0 : i32, i32
  }
  func.func @transform_4(%arg0: i32, %arg1: i32) -> (i32, i32, i32) {
    %c0_i32 = arith.constant 0 : i32
    %c0_i32_0 = arith.constant 0 : i32
    return %arg0, %c0_i32, %arg1 : i32, i32, i32
  }
}

</mosaic_0001>

<bundles_post_ra>
// kernel: tpu_custom_call.1
= control target key start
LH: loop header
LB: loop body
LE: loop exit
PB: predicated region body
PF: predicated region fallthrough
CT: control target
= control target key end

     0   :  { %9 = vsyncpa [#allocation3], 0  ;;  %s802_s0 = inlined_call_operand.vmem [shape: f32[2,4,256], index: 0, kind: input, shape index: {}]   ;;  %s803_s1 = inlined_call_operand.vmem [shape: f32[16,4], index: 1, kind: input, shape index: {}]   ;;  %s804_s2 = inlined_call_operand.vmem [shape: f32[4,8], index: 2, kind: input, shape index: {}]   ;;  %s805_s3 = inlined_call_operand.vmem [shape: f32[4,1], index: 3, kind: input, shape index: {}]   ;;  %s806_s4 = inlined_call_operand.hbm [shape: f32[2,4,256], index: 4, kind: output, shape index: {}]  }
   0x1   :  { %11 = vsyncpa [#allocation3 + $0x1], 0  ;;  %s691_s15 = smov 0   ;;  %s693_s16 = smov 0  }
   0x2   :  { %s695_s17 = smov 0   ;;  %s697_s18 = smov 0  }
   0x3   :  { %s699_s19 = smov 0   ;;  %s701_s20 = smov 0  }
   0x4 LB: > { %s506_s21 = sadd.s32 4294967295, %s661_s20   ;;  %s507_s22 = sadd.s32 4294967294, %s661_s20   ;;  %s661_s20 = sphi %s701_s20, %s17_s20   ;;  %s657_s19 = sphi %s699_s19, %s813_s19   ;;  %s653_s18 = sphi %s697_s18, %s812_s18   ;;  %s649_s17 = sphi %s695_s17, %s811_s17   ;;  %s645_s16 = sphi %s693_s16, %s810_s16   ;;  %s641_s15 = sphi %s691_s15, %s809_s15  }
   0x5   : > { %s29_s23 = sadd.s32 1, %s657_s19  ;;  %s129_s24 = sadd.s32 1, %s649_s17 }
   0x6   : > { %p31_p0 = scmp.ge.s32.totalorder %s29_s23, 2  ;;  %p139_p1 = scmp.ne.s32.totalorder %s649_s17, %s645_s16 }
   0x7   : > { %p140_p2 = scmp.eq.s32.totalorder %s506_s21, 1  ;;  %p145_p3 = scmp.ne.s32.totalorder %s645_s16, %s641_s15 }
   0x8   : > { %s815_s23 = smov (%p31_p0, %s29_s23), 0  ;;  %p146_p5 = scmp.eq.s32.totalorder %s507_s22, 1 }
   0x9   : > { %p731_p4 = por %p140_p2, %p139_p1  ;;  %s124_s26 = ssub.s32 %s657_s19, %s815_s23 }
   0xa   : > { %p510_p6 = scmp.ge.s32.totalorder %s661_s20, 1  ;;  %p127_p7 = scmp.eq.s32.totalorder %s124_s26, 0 }
   0xb   : > { %p738_p8 = por %p146_p5, %p145_p3  ;;  %p186_p9 = scmp.lt.s32.totalorder %s661_s20, 3 }
   0xc   : > { %s744_s28 = scalar_select %p127_p7, %s649_s17, %s129_s24  }
   0xd   : > { %p187_p10 = pnand %p510_p6, %p186_p9 }
   0xe   : > { %p217_p11 = scmp.lt.s32.totalorder (!%p187_p10), %s653_s18, 1  ;;  %s213_s22 = sand.u32 (!%p187_p10), 1, %s645_s16  }
   0xf   : > { %190 = sbr.rel (%p187_p10) target bundleno = 446 (0x1be), region = 36  ;;  %s511_s24 = sshll.u32 (!%p187_p10), %s213_s22, 3 }
  0x10   : > { %s525_s26 = sshll.u32 (!%p187_p10), %s653_s18, 7  ;;  %s414_s8 = scalar_lea.sflag (!%p187_p10), [#allocation3], %s213_s22 }
  0x11   : > { %s665_s10 = smov (!%p187_p10), [#allocation2]  }
  0x12   : > { %s589_s11 = sshll.u32 (!%p187_p10), %s665_s10, 4  ;;  %s590_s11 = int_to_ptr.vmem [resolvable:$false] %s589_s11 }
  0x14   : > { %v663_v0 = vmov 0.0   ;;  %s218_s29 = scalar_select %p217_p11, %s653_s18, 1  ;;  %vm239_vm0 = vcmask 1043456   ;;  %v228_v3 = vld [vmem:[%s803_s1] sm:$0xff]  ;;  %vm232_vm1 = vcmask 31744   ;;  %v229_v4 = vld [vmem:[%s803_s1 + $0x8] sm:$0xff] }
  0x15   : > { %308 = vmatprep.mubr.f32.mxu0 %v663_v0  ;;  %398 = vmatprep.mubr.f32.mxu1 %v663_v0  ;;  %v324_v5 = vld [vmem:[%s805_s3] sm:$0xf]  ;;  %v664_v6 = vmov 0   ;;  %vm330_vm2 = vcmask 64512   ;;  %s591_s18 = scalar_lea.vmem %s590_s11, 256 }
  0x16   : > { %s524_s30 = sshll.u32 %s218_s29, 3  ;;  %583 = vset.pattern.permute.xlu0 %v664_v6  ;;  %v323_v13 = vld [vmem:[%s804_s2] sm:$0xf]  ;;  %s215_s29 = scalar_lea.vmem [#allocation2], %s511_s24 }
  0x17   : > { %s224_s7 = scalar_lea.vmem %s802_s0, %s524_s30  ;;  %327 = vperm.xlu0 %583, %v324_v5   ;;  %s430_s30 = sshll.u32 %s215_s29, 4  ;;  %s431_s30 = int_to_ptr.vmem [resolvable:$true] %s430_s30 }
  0x18   : > { %v227_v1 = vld [vmem:[%s224_s7] sm:$0xff]  ;;  %s428_s7 = scalar_lea.hbm %s806_s4, %s525_s26  ;;  %s585_s9 = scalar_lea.vmem %s431_s30, 128 }
  0x19   : > { %v231_v2 = vcombine.high %v227_v1, %v227_v1  ;;  %p586_p12 = scmp.ne.s32.totalorder %s431_s30, %s585_s9  ;;  %p592_p1 = scmp.lt.s32.totalorder %s431_s30, %s590_s11 }
  0x1a   : > { %p593_p2 = scmp.lt.s32.totalorder %s591_s18, %s585_s9 }
  0x1b   : > { %514 = vmatprep.subr.msk.mxu0 %vm239_vm0, %v231_v2  ;;  %p587_p13 = pnand %p586_p12, %p731_p4 }
  0x1c   : > { %515 = vmatpush1.msk.msra.mxu0 %vm239_vm0, %v227_v1  ;;  %p594_p3 = por %p593_p2, %p592_p1 }
  0x1d   : > { %516 = vmatmul.mubr.msk.f32.vlgmr.msra.gmra.mxu0 %vm232_vm1, %v228_v3  ;;  %p588_p0 = pneg %p587_p13 }
  0x1e   : > { %314 = vmatprep.mubr.f32.mxu0 %v663_v0 }
  0x1f   : > { %p595_p5 = pnand %p594_p3, %p588_p0 }
  0x21   : > { %517 = vmatmul.mubr.msk.f32.gmra.mxu0 %vm232_vm1, %v229_v4 }
  0x92   : > { %v328_v14 = vpop.permute.xlu0 %327 }
  0xdd   : > { %v310_v7 = vpop.f32.mrf.mxu0 }
  0xdf   : > { %v312_v8 = vpop.f32.mrf.mxu0 }
  0xe1   : > { %v316_v9 = vpop.f32.mrf.mxu0 }
  0xe2   : > { %v321_v12 = vmul.f32 %v316_v9, %v310_v7 }
  0xe3   : > { %v318_v10 = vpop.f32.mrf.mxu0 }
  0xe4   : > { %v322_v11 = vmul.f32 %v318_v10, %v312_v8 }
  0xe6   : > { %364 = vmatprep.subr.mxu1 %v322_v11 }
  0xe7   : > { %365 = vmatpush1.msra.mxu1 %v321_v12 }
  0xe8   : > { %518 = vmatmul.mubr.msk.f32.vlgmr.msra.gmra.mxu1 %vm330_vm2, %v323_v13 }
 0x1a8   : > { %v400_v15 = vpop.f32.mrf.mxu1 }
 0x1a9   : > { %v401_v16 = vadd.f32 %v400_v15, %v328_v14 }
 0x1aa   : > { %v402_v17 = vpop.f32.mrf.mxu1 }
 0x1ab   : > { %v403_v18 = vadd.f32 %v402_v17, %v328_v14  ;;  %v406_v19 = vadd.f32 %v401_v16, %v227_v1 }
 0x1ad   : > { %v407_v20 = vadd.f32 %v403_v18, %v231_v2 }
 0x1af   : > { %v410_v21 = vcombine.low %v406_v19, %v407_v20 }
 0x1b1   : > { %412 = vst [vmem:[%s215_s29] sm:$0xff] %v410_v21 }
 0x1b2   : > { %598 = shalt.err (!%p595_p5)
}
 0x1b3   : > { %s599_s12 = scalar_lea.hbm %s428_s7, 128  ;;  %s603_s21 = scalar_lea.hbm %s806_s4, 256 }
 0x1b4   : > { %p600_p6 = scmp.ne.s32.totalorder %s428_s7, %s599_s12  ;;  %p604_p10 = scmp.lt.s32.totalorder %s428_s7, %s806_s4 }
 0x1b5   : > { %p605_p11 = scmp.lt.s32.totalorder %s603_s21, %s599_s12 }
 0x1b6   : > { %p601_p7 = pnand %p600_p6, %p731_p4 }
 0x1b7   : > { %p606_p12 = por %p605_p11, %p604_p10 }
 0x1b8   : > { %p602_p9 = pneg %p601_p7 }
 0x1ba   : > { %p607_p13 = pnand %p606_p12, %p602_p9 }
 0x1bc   : > { %610 = shalt.err (!%p607_p13)
}
 0x1bd   : > { %526 = dma.vmem_to_hbm [thread:$0]  (%p731_p4), %s431_s30, 128, %s428_s7, %s414_s8  }
 0x1be PF: > { %p532_p0 = scmp.ge.s32.totalorder %s661_s20, 2  ;;  %s442_s26 = sand.u32 1, %s641_s15  }
 0x1bf   : > { %s443_s29 = scalar_lea.sflag [#allocation3], %s442_s26 }
 0x1c0   : > { %p529_p1 = pnand %p532_p0, %p738_p8 }
 0x1c2   : > { %p530_p2 = pneg %p529_p1 }
 0x1c4   : > { %636 = dma.done.wait (%p530_p2), %s443_s29, 128  }
 0x1c5   : > { %638 = vsyncadd (%p530_p2), %s443_s29, 4294967168  ;;  %s17_s20 = sadd.s32 1, %s661_s20   ;;  %s809_s15 = smov %s645_s16 }
 0x1c6   : > { %p14_p3 = scmp.ge.s32.totalorder %s17_s20, 4   ;;  %s810_s16 = smov %s649_s17 }
 0x1c7   : > { %s811_s17 = smov %s744_s28  ;;  %s812_s18 = smov %s657_s19 }
 0x1c8   : > { %s813_s19 = smov %s815_s23  ;;  %16 = sbr.rel (!%p14_p3) target bundleno = 4 (0x4), region = 71 }
 0x1cd   :  { %448 = vsyncpa [#allocation3], 1 }
 0x1ce   :  { %450 = vsyncpa [#allocation3 + $0x1], 1 }

</bundles_post_ra>
